<compile_context>
chip_gen: v5e
topology: v5e:2x2
jax: 0.10.0
libtpu: 0.0.40
codegen_flags: <defaults>
</compile_context>

<pallas_src>
import functools
import math

import jax
import jax.numpy as jnp
from jax import lax
from jax.experimental import pallas as pl
from jax.experimental.pallas import tpu as pltpu


def _mha_kernel(q_ref, k_ref, v_ref,
                wq_ref, wk_ref, wv_ref, wo_ref,
                bq_ref, bk_ref, bv_ref, bo_ref,
                o_ref, acc_ref, *, scale):
    h = pl.program_id(1)
    bf = jnp.bfloat16
    f32 = jnp.float32

    q = q_ref[0].astype(bf)            # (S, D)
    k = k_ref[0].astype(bf)
    v = v_ref[0].astype(bf)

    # Per-head projections: contraction over the full d_model (lane-dense
    # inputs), bf16 MXU inputs with f32 accumulation; bias add in f32.
    qh = jnp.dot(q, wq_ref[0], preferred_element_type=f32) + bq_ref[0]   # (S, dh)
    kh = jnp.dot(k, wk_ref[0], preferred_element_type=f32) + bk_ref[0]   # (S, dh)
    vh = jnp.dot(v, wv_ref[0], preferred_element_type=f32) + bv_ref[0]   # (S, dh)

    # Scores: contract the last dim of Q and K directly — no materialized K^T.
    s = lax.dot_general(qh.astype(bf), kh.astype(bf),
                        (((1,), (1,)), ((), ())),
                        preferred_element_type=f32) * scale              # (S, S)

    # Softmax in f32; the normalization reciprocal runs on the EUP.
    s = s - jnp.max(s, axis=-1, keepdims=True)
    p = jnp.exp(s)
    p = p * pl.reciprocal(jnp.sum(p, axis=-1, keepdims=True), approx=True)

    ctx = jnp.dot(p.astype(bf), vh.astype(bf),
                  preferred_element_type=f32)                            # (S, dh)

    # This head's contribution to the output projection (lane-dense (S, D)).
    partial = jnp.dot(ctx.astype(bf), wo_ref[0], preferred_element_type=f32)

    @pl.when(h == 0)
    def _():
        acc_ref[...] = bo_ref[...] + partial

    @pl.when(h > 0)
    def _():
        acc_ref[...] += partial

    @pl.when(h == pl.num_programs(1) - 1)
    def _():
        o_ref[0] = acc_ref[...].astype(o_ref.dtype)


def multi_head_attention(q, k, v, params, n_heads):
    B, S, D = q.shape
    assert D % n_heads == 0, "d_model must be divisible by n_heads"
    dh = D // n_heads
    scale = 1.0 / math.sqrt(dh)
    bf = jnp.bfloat16

    # Host-side weight re-layout into per-head tiles so the kernel never
    # slices the lane axis; matmul weights stored as bf16 (MXU-native).
    wq_h = jnp.transpose(params["wq"].reshape(D, n_heads, dh), (1, 0, 2)).astype(bf)  # (H, D, dh)
    wk_h = jnp.transpose(params["wk"].reshape(D, n_heads, dh), (1, 0, 2)).astype(bf)
    wv_h = jnp.transpose(params["wv"].reshape(D, n_heads, dh), (1, 0, 2)).astype(bf)
    wo_h = params["wo"].reshape(n_heads, dh, D).astype(bf)                            # (H, dh, D)
    bq_h = params["bq"].reshape(n_heads, 1, dh)                                       # (H, 1, dh) f32
    bk_h = params["bk"].reshape(n_heads, 1, dh)
    bv_h = params["bv"].reshape(n_heads, 1, dh)
    bo = params["bo"].reshape(1, D)                                                   # (1, D) f32

    kernel = functools.partial(_mha_kernel, scale=scale)

    seq_spec = pl.BlockSpec((1, S, D), lambda b, h: (b, 0, 0))
    w_in_spec = pl.BlockSpec((1, D, dh), lambda b, h: (h, 0, 0))
    w_out_spec = pl.BlockSpec((1, dh, D), lambda b, h: (h, 0, 0))
    b_in_spec = pl.BlockSpec((1, 1, dh), lambda b, h: (h, 0, 0))
    bo_spec = pl.BlockSpec((1, D), lambda b, h: (0, 0))

    return pl.pallas_call(
        kernel,
        out_shape=jax.ShapeDtypeStruct((B, S, D), jnp.float32),
        grid=(B, n_heads),                       # reduction (head) axis last
        in_specs=[seq_spec, seq_spec, seq_spec,
                  w_in_spec, w_in_spec, w_in_spec, w_out_spec,
                  b_in_spec, b_in_spec, b_in_spec, bo_spec],
        out_specs=pl.BlockSpec((1, S, D), lambda b, h: (b, 0, 0)),
        scratch_shapes=[pltpu.VMEM((S, D), jnp.float32)],
        compiler_params=pltpu.CompilerParams(
            dimension_semantics=("parallel", "arbitrary")),
    )(q, k, v, wq_h, wk_h, wv_h, wo_h, bq_h, bk_h, bv_h, bo)


def _init_params(key, d_model):
    # Deterministic init matching nn.Linear's U(-1/sqrt(fan_in), 1/sqrt(fan_in)).
    bound = 1.0 / math.sqrt(d_model)
    keys = jax.random.split(key, 8)

    def u(k, shape):
        return jax.random.uniform(k, shape, jnp.float32, -bound, bound)

    return {
        "wq": u(keys[0], (d_model, d_model)),
        "wk": u(keys[1], (d_model, d_model)),
        "wv": u(keys[2], (d_model, d_model)),
        "wo": u(keys[3], (d_model, d_model)),
        "bq": u(keys[4], (1, d_model)),
        "bk": u(keys[5], (1, d_model)),
        "bv": u(keys[6], (1, d_model)),
        "bo": u(keys[7], (1, d_model)),
    }


def _reference(q, k, v, params, n_heads):
    # Pure-JAX reference of the same MHA forward (mask=None), mirroring the
    # kernel's mixed precision: bf16 matmul inputs, f32 accumulation/softmax.
    B, S, D = q.shape
    dh = D // n_heads
    bf, f32 = jnp.bfloat16, jnp.float32

    def mm(a, b):
        return jnp.einsum("...ij,jk->...ik", a.astype(bf), b.astype(bf),
                          preferred_element_type=f32)

    Q = mm(q, params["wq"]) + params["bq"]
    K = mm(k, params["wk"]) + params["bk"]
    V = mm(v, params["wv"]) + params["bv"]
    Qh = Q.reshape(B, S, n_heads, dh).transpose(0, 2, 1, 3)
    Kh = K.reshape(B, S, n_heads, dh).transpose(0, 2, 1, 3)
    Vh = V.reshape(B, S, n_heads, dh).transpose(0, 2, 1, 3)
    s = jnp.einsum("bhqd,bhkd->bhqk", Qh.astype(bf), Kh.astype(bf),
                   preferred_element_type=f32) / math.sqrt(dh)
    p = jax.nn.softmax(s, axis=-1)
    ctx = jnp.einsum("bhqk,bhkd->bhqd", p.astype(bf), Vh.astype(bf),
                     preferred_element_type=f32)
    ctx = ctx.transpose(0, 2, 1, 3).reshape(B, S, D)
    return mm(ctx, params["wo"]) + params["bo"]


if __name__ == "__main__":
    B, S, D, H = 2, 8, 32, 4

    key = jax.random.PRNGKey(0)
    k_p, k_q, k_k, k_v = jax.random.split(key, 4)
    params = _init_params(k_p, D)
    q = jax.random.normal(k_q, (B, S, D), jnp.float32)
    k = jax.random.normal(k_k, (B, S, D), jnp.float32)
    v = jax.random.normal(k_v, (B, S, D), jnp.float32)

    out = multi_head_attention(q, k, v, params, H)
    out = jax.block_until_ready(out)

    ref = _reference(q, k, v, params, H)
    assert out.shape == (B, S, D)
    err = float(jnp.max(jnp.abs(out - ref)))
    assert jnp.allclose(out, ref, atol=5e-3, rtol=5e-3), f"max abs err {err}"
    print("KERNEL_OK")
</pallas_src>

<mosaic_0001>
module attributes {stable_mosaic.version = 11 : i64} {
  func.func @_mha_kernel(%arg0: i32, %arg1: i32, %arg2: memref<1x8x32xf32, #tpu.memory_space<vmem>>, %arg3: memref<1x8x32xf32, #tpu.memory_space<vmem>>, %arg4: memref<1x8x32xf32, #tpu.memory_space<vmem>>, %arg5: memref<1x32x8xbf16, #tpu.memory_space<vmem>>, %arg6: memref<1x32x8xbf16, #tpu.memory_space<vmem>>, %arg7: memref<1x32x8xbf16, #tpu.memory_space<vmem>>, %arg8: memref<1x8x32xbf16, #tpu.memory_space<vmem>>, %arg9: memref<1x1x8xf32, #tpu.memory_space<vmem>>, %arg10: memref<1x1x8xf32, #tpu.memory_space<vmem>>, %arg11: memref<1x1x8xf32, #tpu.memory_space<vmem>>, %arg12: memref<1x32xf32, #tpu.memory_space<vmem>>, %arg13: memref<1x8x32xf32, #tpu.memory_space<vmem>>, %arg14: memref<8x32xf32, #tpu.memory_space<vmem>>) attributes {dimension_semantics = [#tpu.dimension_semantics<parallel>, #tpu.dimension_semantics<arbitrary>], iteration_bounds = array<i64: 2, 4>, scalar_prefetch = 0 : i64, scratch_operands = 1 : i64, tpu.core_type = #tpu.core_type<tc>, window_params = [{transform_indices = @transform_0, window_bounds = array<i64: 1, 8, 32>}, {transform_indices = @transform_1, window_bounds = array<i64: 1, 8, 32>}, {transform_indices = @transform_2, window_bounds = array<i64: 1, 8, 32>}, {transform_indices = @transform_3, window_bounds = array<i64: 1, 32, 8>}, {transform_indices = @transform_4, window_bounds = array<i64: 1, 32, 8>}, {transform_indices = @transform_5, window_bounds = array<i64: 1, 32, 8>}, {transform_indices = @transform_6, window_bounds = array<i64: 1, 8, 32>}, {transform_indices = @transform_7, window_bounds = array<i64: 1, 1, 8>}, {transform_indices = @transform_8, window_bounds = array<i64: 1, 1, 8>}, {transform_indices = @transform_9, window_bounds = array<i64: 1, 1, 8>}, {pipeline_mode = #tpu.pipeline_mode<synchronous>, transform_indices = @transform_10, window_bounds = array<i64: 1, 32>}, {transform_indices = @transform_11, window_bounds = array<i64: 1, 8, 32>}]} {
    %c0 = arith.constant 0 : index
    %c0_0 = arith.constant 0 : index
    %c0_1 = arith.constant 0 : index
    %0 = vector.load %arg2[%c0, %c0_0, %c0_1] : memref<1x8x32xf32, #tpu.memory_space<vmem>>, vector<1x8x32xf32>
    %1 = vector.shape_cast %0 : vector<1x8x32xf32> to vector<8x32xf32>
    %2 = arith.truncf %1 : vector<8x32xf32> to vector<8x32xbf16>
    %c0_2 = arith.constant 0 : index
    %c0_3 = arith.constant 0 : index
    %c0_4 = arith.constant 0 : index
    %3 = vector.load %arg3[%c0_2, %c0_3, %c0_4] : memref<1x8x32xf32, #tpu.memory_space<vmem>>, vector<1x8x32xf32>
    %4 = vector.shape_cast %3 : vector<1x8x32xf32> to vector<8x32xf32>
    %5 = arith.truncf %4 : vector<8x32xf32> to vector<8x32xbf16>
    %c0_5 = arith.constant 0 : index
    %c0_6 = arith.constant 0 : index
    %c0_7 = arith.constant 0 : index
    %6 = vector.load %arg4[%c0_5, %c0_6, %c0_7] : memref<1x8x32xf32, #tpu.memory_space<vmem>>, vector<1x8x32xf32>
    %7 = vector.shape_cast %6 : vector<1x8x32xf32> to vector<8x32xf32>
    %8 = arith.truncf %7 : vector<8x32xf32> to vector<8x32xbf16>
    %c0_8 = arith.constant 0 : index
    %c0_9 = arith.constant 0 : index
    %c0_10 = arith.constant 0 : index
    %9 = vector.load %arg5[%c0_8, %c0_9, %c0_10] : memref<1x32x8xbf16, #tpu.memory_space<vmem>>, vector<1x32x8xbf16>
    %10 = vector.shape_cast %9 : vector<1x32x8xbf16> to vector<32x8xbf16>
    %cst = arith.constant dense<0.000000e+00> : vector<8x8xf32>
    %11 = tpu.matmul %2, %10, %cst {dimension_numbers = #tpu.dot_dimension_numbers<[1], [0], [0], [1], [0, 0, 1, 1], [], []>} : vector<8x32xbf16>, vector<32x8xbf16>, vector<8x8xf32> -> vector<8x8xf32>
    %c0_11 = arith.constant 0 : index
    %c0_12 = arith.constant 0 : index
    %c0_13 = arith.constant 0 : index
    %12 = vector.load %arg9[%c0_11, %c0_12, %c0_13] : memref<1x1x8xf32, #tpu.memory_space<vmem>>, vector<1x1x8xf32>
    %13 = vector.shape_cast %12 : vector<1x1x8xf32> to vector<1x8xf32>
    %14 = vector.broadcast %13 : vector<1x8xf32> to vector<8x8xf32>
    %15 = arith.addf %11, %14 : vector<8x8xf32>
    %c0_14 = arith.constant 0 : index
    %c0_15 = arith.constant 0 : index
    %c0_16 = arith.constant 0 : index
    %16 = vector.load %arg6[%c0_14, %c0_15, %c0_16] : memref<1x32x8xbf16, #tpu.memory_space<vmem>>, vector<1x32x8xbf16>
    %17 = vector.shape_cast %16 : vector<1x32x8xbf16> to vector<32x8xbf16>
    %cst_17 = arith.constant dense<0.000000e+00> : vector<8x8xf32>
    %18 = tpu.matmul %5, %17, %cst_17 {dimension_numbers = #tpu.dot_dimension_numbers<[1], [0], [0], [1], [0, 0, 1, 1], [], []>} : vector<8x32xbf16>, vector<32x8xbf16>, vector<8x8xf32> -> vector<8x8xf32>
    %c0_18 = arith.constant 0 : index
    %c0_19 = arith.constant 0 : index
    %c0_20 = arith.constant 0 : index
    %19 = vector.load %arg10[%c0_18, %c0_19, %c0_20] : memref<1x1x8xf32, #tpu.memory_space<vmem>>, vector<1x1x8xf32>
    %20 = vector.shape_cast %19 : vector<1x1x8xf32> to vector<1x8xf32>
    %21 = vector.broadcast %20 : vector<1x8xf32> to vector<8x8xf32>
    %22 = arith.addf %18, %21 : vector<8x8xf32>
    %c0_21 = arith.constant 0 : index
    %c0_22 = arith.constant 0 : index
    %c0_23 = arith.constant 0 : index
    %23 = vector.load %arg7[%c0_21, %c0_22, %c0_23] : memref<1x32x8xbf16, #tpu.memory_space<vmem>>, vector<1x32x8xbf16>
    %24 = vector.shape_cast %23 : vector<1x32x8xbf16> to vector<32x8xbf16>
    %cst_24 = arith.constant dense<0.000000e+00> : vector<8x8xf32>
    %25 = tpu.matmul %8, %24, %cst_24 {dimension_numbers = #tpu.dot_dimension_numbers<[1], [0], [0], [1], [0, 0, 1, 1], [], []>} : vector<8x32xbf16>, vector<32x8xbf16>, vector<8x8xf32> -> vector<8x8xf32>
    %c0_25 = arith.constant 0 : index
    %c0_26 = arith.constant 0 : index
    %c0_27 = arith.constant 0 : index
    %26 = vector.load %arg11[%c0_25, %c0_26, %c0_27] : memref<1x1x8xf32, #tpu.memory_space<vmem>>, vector<1x1x8xf32>
    %27 = vector.shape_cast %26 : vector<1x1x8xf32> to vector<1x8xf32>
    %28 = vector.broadcast %27 : vector<1x8xf32> to vector<8x8xf32>
    %29 = arith.addf %25, %28 : vector<8x8xf32>
    %30 = arith.truncf %15 : vector<8x8xf32> to vector<8x8xbf16>
    %31 = arith.truncf %22 : vector<8x8xf32> to vector<8x8xbf16>
    %cst_28 = arith.constant dense<0.000000e+00> : vector<8x8xf32>
    %32 = tpu.matmul %30, %31, %cst_28 {dimension_numbers = #tpu.dot_dimension_numbers<[1], [1], [0], [0], [0, 0, 1, 0], [], []>} : vector<8x8xbf16>, vector<8x8xbf16>, vector<8x8xf32> -> vector<8x8xf32>
    %cst_29 = arith.constant 0.353553385 : f32
    %33 = vector.broadcast %cst_29 : f32 to vector<8x8xf32>
    %34 = arith.mulf %32, %33 : vector<8x8xf32>
    %cst_30 = arith.constant dense<0xFF800000> : vector<8xf32>
    %35 = vector.multi_reduction <maximumf>, %34, %cst_30 [1] : vector<8x8xf32> to vector<8xf32>
    %36 = vector.shape_cast %35 : vector<8xf32> to vector<8x1xf32>
    %37 = vector.broadcast %36 : vector<8x1xf32> to vector<8x8xf32>
    %38 = arith.subf %34, %37 : vector<8x8xf32>
    %39 = math.exp %38 : vector<8x8xf32>
    %cst_31 = arith.constant dense<0.000000e+00> : vector<8xf32>
    %40 = vector.multi_reduction <add>, %39, %cst_31 [1] : vector<8x8xf32> to vector<8xf32>
    %41 = vector.shape_cast %40 : vector<8xf32> to vector<8x1xf32>
    %42 = tpu.reciprocal %41 {approx = true} : vector<8x1xf32> -> vector<8x1xf32>
    %43 = vector.broadcast %42 : vector<8x1xf32> to vector<8x8xf32>
    %44 = arith.mulf %39, %43 : vector<8x8xf32>
    %45 = arith.truncf %44 : vector<8x8xf32> to vector<8x8xbf16>
    %46 = arith.truncf %29 : vector<8x8xf32> to vector<8x8xbf16>
    %cst_32 = arith.constant dense<0.000000e+00> : vector<8x8xf32>
    %47 = tpu.matmul %45, %46, %cst_32 {dimension_numbers = #tpu.dot_dimension_numbers<[1], [0], [0], [1], [0, 0, 1, 1], [], []>} : vector<8x8xbf16>, vector<8x8xbf16>, vector<8x8xf32> -> vector<8x8xf32>
    %48 = arith.truncf %47 : vector<8x8xf32> to vector<8x8xbf16>
    %c0_33 = arith.constant 0 : index
    %c0_34 = arith.constant 0 : index
    %c0_35 = arith.constant 0 : index
    %49 = vector.load %arg8[%c0_33, %c0_34, %c0_35] : memref<1x8x32xbf16, #tpu.memory_space<vmem>>, vector<1x8x32xbf16>
    %50 = vector.shape_cast %49 : vector<1x8x32xbf16> to vector<8x32xbf16>
    %cst_36 = arith.constant dense<0.000000e+00> : vector<8x32xf32>
    %51 = tpu.matmul %48, %50, %cst_36 {dimension_numbers = #tpu.dot_dimension_numbers<[1], [0], [0], [1], [0, 0, 1, 1], [], []>} : vector<8x8xbf16>, vector<8x32xbf16>, vector<8x32xf32> -> vector<8x32xf32>
    %c0_i32 = arith.constant 0 : i32
    %52 = arith.cmpi eq, %arg1, %c0_i32 : i32
    %53 = arith.extui %52 : i1 to i32
    %c0_i32_37 = arith.constant 0 : i32
    %54 = arith.cmpi ne, %53, %c0_i32_37 : i32
    scf.if %54 {
      %c0_41 = arith.constant 0 : index
      %c0_42 = arith.constant 0 : index
      %61 = vector.load %arg12[%c0_41, %c0_42] : memref<1x32xf32, #tpu.memory_space<vmem>>, vector<1x32xf32>
      %62 = vector.broadcast %61 : vector<1x32xf32> to vector<8x32xf32>
      %63 = arith.addf %62, %51 : vector<8x32xf32>
      %c0_43 = arith.constant 0 : index
      %c0_44 = arith.constant 0 : index
      %64 = vector.load %arg14[%c0_43, %c0_44] : memref<8x32xf32, #tpu.memory_space<vmem>>, vector<8x32xf32>
      tpu.vector_store %arg14[%c0_43, %c0_44], %63 {strides = array<i32>} : memref<8x32xf32, #tpu.memory_space<vmem>>, vector<8x32xf32>,
    } else {
    }
    %c0_i32_38 = arith.constant 0 : i32
    %55 = arith.cmpi sgt, %arg1, %c0_i32_38 : i32
    %56 = arith.extui %55 : i1 to i32
    %c0_i32_39 = arith.constant 0 : i32
    %57 = arith.cmpi ne, %56, %c0_i32_39 : i32
    scf.if %57 {
      %c0_41 = arith.constant 0 : index
      %c0_42 = arith.constant 0 : index
      %61 = vector.load %arg14[%c0_41, %c0_42] : memref<8x32xf32, #tpu.memory_space<vmem>>, vector<8x32xf32>
      %62 = arith.addf %61, %51 : vector<8x32xf32>
      %c0_43 = arith.constant 0 : index
      %c0_44 = arith.constant 0 : index
      %63 = vector.load %arg14[%c0_43, %c0_44] : memref<8x32xf32, #tpu.memory_space<vmem>>, vector<8x32xf32>
      tpu.vector_store %arg14[%c0_43, %c0_44], %62 {strides = array<i32>} : memref<8x32xf32, #tpu.memory_space<vmem>>, vector<8x32xf32>,
    } else {
    }
    %c3_i32 = arith.constant 3 : i32
    %58 = arith.cmpi eq, %arg1, %c3_i32 : i32
    %59 = arith.extui %58 : i1 to i32
    %c0_i32_40 = arith.constant 0 : i32
    %60 = arith.cmpi ne, %59, %c0_i32_40 : i32
    scf.if %60 {
      %c0_41 = arith.constant 0 : index
      %c0_42 = arith.constant 0 : index
      %61 = vector.load %arg14[%c0_41, %c0_42] : memref<8x32xf32, #tpu.memory_space<vmem>>, vector<8x32xf32>
      %c0_43 = arith.constant 0 : index
      %c0_44 = arith.constant 0 : index
      %c0_45 = arith.constant 0 : index
      %62 = vector.load %arg13[%c0_43, %c0_44, %c0_45] : memref<1x8x32xf32, #tpu.memory_space<vmem>>, vector<1x8x32xf32>
      %63 = vector.shape_cast %62 : vector<1x8x32xf32> to vector<8x32xf32>
      %64 = vector.shape_cast %61 : vector<8x32xf32> to vector<1x8x32xf32>
      tpu.vector_store %arg13[%c0_43, %c0_44, %c0_45], %64 {strides = array<i32>} : memref<1x8x32xf32, #tpu.memory_space<vmem>>, vector<1x8x32xf32>,
    } else {
    }
    return
  }
  func.func @transform_0(%arg0: i32, %arg1: i32) -> (i32, i32, i32) {
    %c0_i32 = arith.constant 0 : i32
    %c0_i32_0 = arith.constant 0 : i32
    %c0_i32_1 = arith.constant 0 : i32
    return %arg0, %c0_i32, %c0_i32_0 : i32, i32, i32
  }
  func.func @transform_1(%arg0: i32, %arg1: i32) -> (i32, i32, i32) {
    %c0_i32 = arith.constant 0 : i32
    %c0_i32_0 = arith.constant 0 : i32
    %c0_i32_1 = arith.constant 0 : i32
    return %arg0, %c0_i32, %c0_i32_0 : i32, i32, i32
  }
  func.func @transform_2(%arg0: i32, %arg1: i32) -> (i32, i32, i32) {
    %c0_i32 = arith.constant 0 : i32
    %c0_i32_0 = arith.constant 0 : i32
    %c0_i32_1 = arith.constant 0 : i32
    return %arg0, %c0_i32, %c0_i32_0 : i32, i32, i32
  }
  func.func @transform_3(%arg0: i32, %arg1: i32) -> (i32, i32, i32) {
    %c0_i32 = arith.constant 0 : i32
    %c0_i32_0 = arith.constant 0 : i32
    %c0_i32_1 = arith.constant 0 : i32
    return %arg1, %c0_i32, %c0_i32_0 : i32, i32, i32
  }
  func.func @transform_4(%arg0: i32, %arg1: i32) -> (i32, i32, i32) {
    %c0_i32 = arith.constant 0 : i32
    %c0_i32_0 = arith.constant 0 : i32
    %c0_i32_1 = arith.constant 0 : i32
    return %arg1, %c0_i32, %c0_i32_0 : i32, i32, i32
  }
  func.func @transform_5(%arg0: i32, %arg1: i32) -> (i32, i32, i32) {
    %c0_i32 = arith.constant 0 : i32
    %c0_i32_0 = arith.constant 0 : i32
    %c0_i32_1 = arith.constant 0 : i32
    return %arg1, %c0_i32, %c0_i32_0 : i32, i32, i32
  }
  func.func @transform_6(%arg0: i32, %arg1: i32) -> (i32, i32, i32) {
    %c0_i32 = arith.constant 0 : i32
    %c0_i32_0 = arith.constant 0 : i32
    %c0_i32_1 = arith.constant 0 : i32
    return %arg1, %c0_i32, %c0_i32_0 : i32, i32, i32
  }
  func.func @transform_7(%arg0: i32, %arg1: i32) -> (i32, i32, i32) {
    %c0_i32 = arith.constant 0 : i32
    %c0_i32_0 = arith.constant 0 : i32
    %c0_i32_1 = arith.constant 0 : i32
    return %arg1, %c0_i32, %c0_i32_0 : i32, i32, i32
  }
  func.func @transform_8(%arg0: i32, %arg1: i32) -> (i32, i32, i32) {
    %c0_i32 = arith.constant 0 : i32
    %c0_i32_0 = arith.constant 0 : i32
    %c0_i32_1 = arith.constant 0 : i32
    return %arg1, %c0_i32, %c0_i32_0 : i32, i32, i32
  }
  func.func @transform_9(%arg0: i32, %arg1: i32) -> (i32, i32, i32) {
    %c0_i32 = arith.constant 0 : i32
    %c0_i32_0 = arith.constant 0 : i32
    %c0_i32_1 = arith.constant 0 : i32
    return %arg1, %c0_i32, %c0_i32_0 : i32, i32, i32
  }
  func.func @transform_10(%arg0: i32, %arg1: i32) -> (i32, i32) {
    %c0_i32 = arith.constant 0 : i32
    %c0_i32_0 = arith.constant 0 : i32
    %c0_i32_1 = arith.constant 0 : i32
    return %c0_i32, %c0_i32_0 : i32, i32
  }
  func.func @transform_11(%arg0: i32, %arg1: i32) -> (i32, i32, i32) {
    %c0_i32 = arith.constant 0 : i32
    %c0_i32_0 = arith.constant 0 : i32
    %c0_i32_1 = arith.constant 0 : i32
    return %arg0, %c0_i32, %c0_i32_0 : i32, i32, i32
  }
}

</mosaic_0001>

<bundles_post_ra>
// kernel: tpu_custom_call.1
= control target key start
LH: loop header
LB: loop body
LE: loop exit
PB: predicated region body
PF: predicated region fallthrough
CT: control target
= control target key end

     0   :  { %s1433_s0 = inlined_call_operand.vmem [shape: f32[2,8,32], index: 0, kind: input, shape index: {}]   ;;  %s1434_s1 = inlined_call_operand.vmem [shape: f32[2,8,32], index: 1, kind: input, shape index: {}]   ;;  %s1435_s2 = inlined_call_operand.vmem [shape: f32[2,8,32], index: 2, kind: input, shape index: {}]   ;;  %s1436_s3 = inlined_call_operand.vmem [shape: bf16[4,32,8], index: 3, kind: input, shape index: {}]   ;;  %s1437_s4 = inlined_call_operand.vmem [shape: bf16[4,32,8], index: 4, kind: input, shape index: {}]   ;;  %s1438_s5 = inlined_call_operand.vmem [shape: bf16[4,32,8], index: 5, kind: input, shape index: {}]   ;;  %s1439_s6 = inlined_call_operand.vmem [shape: bf16[4,8,32], index: 6, kind: input, shape index: {}]   ;;  %s1440_s7 = inlined_call_operand.vmem [shape: f32[4,1,8], index: 7, kind: input, shape index: {}]   ;;  %s1441_s8 = inlined_call_operand.vmem [shape: f32[4,1,8], index: 8, kind: input, shape index: {}]   ;;  %s1442_s9 = inlined_call_operand.vmem [shape: f32[4,1,8], index: 9, kind: input, shape index: {}]   ;;  %s1443_s10 = inlined_call_operand.vmem [shape: f32[1,32], index: 10, kind: input, shape index: {}]   ;;  %s1444_s11 = inlined_call_operand.hbm [shape: f32[2,8,32], index: 11, kind: output, shape index: {}]  }
   0x1   :  { %1455 = sst [smem:[#allocation15_spill]] %s1440_s7 }
   0x2   :  { %1456 = sst [smem:[#allocation16_spill]] %s1444_s11 }
   0x3   :  { %16 = vsyncpa [#allocation4], 0 }
   0x4   :  { %18 = vsyncpa [#allocation4 + $0x1], 0  ;;  %s1245_s17 = smov 0   ;;  %s1247_s18 = smov 0  }
   0x5   :  { %s1249_s19 = smov 0   ;;  %s1251_s20 = smov 0  }
   0x6   :  { %s1253_s21 = smov 0   ;;  %s1255_s22 = smov 0  }
   0x7   :  { %s1257_s23 = smov 0   ;;  %s1259_s24 = smov 0  }
   0x8 LB: > { %1457 = sst [smem:[#allocation6_spill]] %s1155_s17  ;;  %s948_s25 = sadd.s32 4294967295, %s1183_s24   ;;  %s1183_s24 = sphi %s1259_s24, %s24_s24   ;;  %s1179_s23 = sphi %s1257_s23, %s1480_s23   ;;  %s1175_s22 = sphi %s1255_s22, %s1479_s22   ;;  %s1171_s21 = sphi %s1253_s21, %s1478_s21   ;;  %s1167_s20 = sphi %s1251_s20, %s1477_s20   ;;  %s1163_s19 = sphi %s1249_s19, %s1476_s19   ;;  %s1159_s18 = sphi %s1247_s18, %s1482_s18   ;;  %s1155_s17 = sphi %s1245_s17, %s1481_s17  }
   0x9   : > { %1458 = sst [smem:[#allocation7_spill]] %s1163_s19  ;;  %s949_s26 = sadd.s32 4294967294, %s1183_s24  }
   0xa   : > { %1459 = sst [smem:[#allocation8_spill]] %s1175_s22  ;;  %s33_s27 = sadd.s32 1, %s1175_s22 }
   0xb   : > { %1460 = sst [smem:[#allocation9_spill]] %s1179_s23  ;;  %p34_p0 = scmp.ge.s32.totalorder %s33_s27, 4 }
   0xc   : > { %1461 = sst [smem:[#allocation10_spill]] %s1183_s24  ;;  %s36_s28 = sadd.s32 1, %s1179_s23 }
   0xd   : > { %p334_p1 = scmp.ne.s32.totalorder %s1163_s19, %s1159_s18  ;;  %p335_p2 = scmp.eq.s32.totalorder %s948_s25, 7 }
   0xe   : > { %s1484_s27 = smov (%p34_p0, %s33_s27), 0  ;;  %s1486_s28 = smov (!%p34_p0, %s36_s28), %s1179_s23 }
   0xf   : > { %1462 = sst [smem:[#allocation11_spill]] %s1484_s27  ;;  %p1294_p3 = por %p335_p2, %p334_p1 }
  0x10   : > { %p340_p4 = scmp.ne.s32.totalorder %s1159_s18, %s1155_s17  ;;  %p38_p5 = scmp.ge.s32.totalorder %s1486_s28, 2 }
  0x11   : > { %p341_p6 = scmp.eq.s32.totalorder %s949_s26, 7  ;;  %p952_p7 = scmp.ge.s32.totalorder %s1183_s24, 1 }
  0x12   : > { %p432_p8 = scmp.lt.s32.totalorder %s1183_s24, 9  ;;  %s1488_s28 = smov (%p38_p5, %s1486_s28), 0 }
  0x13   : > { %1464 = sst [smem:[#allocation12_spill]] %s1488_s28  ;;  %p1304_p9 = por %p341_p6, %p340_p4 }
  0x14   : > { %p433_p10 = pnand %p952_p7, %p432_p8  ;;  %s321_s12 = ssub.s32 %s1179_s23, %s1488_s28 }
  0x15   : > { %s1465_s30 = scalar_select %p1304_p9, 1, 0 }
  0x16   : > { %s324_s13 = sadd.s32 1, %s1163_s19  ;;  %p322_p11 = scmp.eq.s32.totalorder %s321_s12, 0 }
  0x17   : > { %1466 = sst [smem:[#allocation13_spill]] %s1465_s30  ;;  %436 = sbr.rel (%p433_p10) target bundleno = 875 (0x36b), region = 64 }
  0x18   : > { %s1312_s14 = scalar_select %p322_p11, %s1163_s19, %s324_s13  }
  0x19   : > { %s1448_s15 = sand.u32 (!%p433_p10), 1, %s1159_s18   ;;  %p519_p12 = scmp.lt.s32.totalorder (!%p433_p10), %s1167_s20, 3 }
  0x1a   : > { %1467 = sst [smem:[#allocation14_spill]] %s1312_s14  ;;  %s1318_s16 = sshll.u32 (!%p433_p10), %s1448_s15, 3 }
  0x1b   : > { %p507_p13 = scmp.lt.s32.totalorder (!%p433_p10), %s1171_s21, 1  ;;  %s1468_s7 = sld [smem:[#allocation15_spill]] (!%p433_p10) }
  0x1c   : > { %s1322_s25 = scalar_select %p519_p12, %s1167_s20, 3  ;;  %vm574_vm0 = vcmask 261120   ;;  %vm665_vm1 = vcmask 64512   ;;  %vm702_vm2 = vcmask 1043456  }
  0x1d   : > { %s508_s26 = scalar_select %p507_p13, %s1171_s21, 1 }
  0x1e   : > { %s1326_s12 = sshll.u32 %s1322_s25, 4  ;;  %s543_s14 = scalar_lea.vmem %s1441_s8, %s1322_s25 }
  0x1f   : > { %s523_s15 = scalar_lea.vmem %s1436_s3, %s1326_s12  ;;  %s528_s30 = scalar_lea.vmem %s1437_s4, %s1326_s12  ;;  %v1082_v8 = vld [vmem:[%s543_s14] ss:$0 sm:$0xff] }
  0x20   : > { %v1005_v0 = vld [vmem:[%s523_s15 + $0x8] sm:$0xff]  ;;  %s1340_s17 = sshll.u32 %s508_s26, 3  ;;  %v1004_v2 = vld [vmem:[%s523_s15] sm:$0xff]  ;;  %s533_s24 = scalar_lea.vmem %s1438_s5, %s1326_s12 }
  0x21   : > { %s540_s27 = scalar_lea.vmem %s1468_s7, %s1322_s25  ;;  %v1007_v1 = vld [vmem:[%s528_s30 + $0x8] sm:$0xff]  ;;  %s510_s13 = scalar_lea.vmem %s1433_s0, %s1340_s17  ;;  %584 = vmatpush.bf16.msra.mxu0 %v1005_v0  ;;  %v1006_v3 = vld [vmem:[%s528_s30] sm:$0xff] }
  0x22   : > { %s514_s22 = scalar_lea.vmem %s1434_s1, %s1340_s17  ;;  %620 = vmatpush.bf16.msra.mxu1 %v1007_v1  ;;  %v548_v4 = vld [vmem:[%s510_s13] sm:$0xff]  ;;  %v1009_v19 = vld [vmem:[%s533_s24 + $0x8] sm:$0xff]  ;;  %s546_s12 = scalar_lea.vmem %s1442_s9, %s1322_s25 }
  0x23   : > { %v550_v5 = vld [vmem:[%s514_s22] sm:$0xff]  ;;  %v549_v6 = vpack.c.bf16 %v548_v4, %v548_v4  ;;  %656 = vmatpush.bf16.msra.mxu2 %v1009_v19  ;;  %p994_p0 = scmp.ne.s32.totalorder %s1167_s20, 0 }
  0x24   : > { %v551_v7 = vpack.c.bf16 %v550_v5, %v550_v5  ;;  %v1081_v11 = vld [vmem:[%s540_s27] ss:$0 sm:$0xff]  ;;  %s518_s27 = scalar_lea.vmem %s1435_s2, %s1340_s17  ;;  %s963_s17 = sshll.u32 %s1322_s25, 2 }
  0x25   : > { %585 = vmatpush.bf16.msra.mxu0 %v1004_v2  ;;  %v1008_v20 = vld [vmem:[%s533_s24] sm:$0xff]  ;;  %s537_s19 = scalar_lea.vmem %s1439_s6, %s963_s17  ;;  %s506_s25 = scalar_lea.vmem [#allocation3], %s1318_s16 }
  0x26   : > { %621 = vmatpush.bf16.msra.mxu1 %v1006_v3  ;;  %v552_v21 = vld [vmem:[%s518_s27] sm:$0xff] }
  0x27   : > { %v553_v22 = vpack.c.bf16 %v552_v21, %v552_v21  ;;  %657 = vmatpush.bf16.msra.mxu2 %v1008_v20  ;;  %v1083_v27 = vld [vmem:[%s546_s12] ss:$0 sm:$0xff] }
  0x28   : > { %972 = vmatmul.msk.bf16.vlgmr.msra.gmra.mxu0 %vm574_vm0, %v549_v6  ;;  %v720_v38 = vld [vmem:[%s537_s19] sm:$0xf] }
  0x29   : > { %981 = vmatmul.msk.bf16.vlgmr.msra.gmra.mxu1 %vm574_vm0, %v551_v7  ;;  %v725_v39 = vsel %vm702_vm2, %v720_v38, 0 }
  0x2a   : > { %990 = vmatmul.msk.bf16.vlgmr.msra.gmra.mxu2 %vm574_vm0, %v553_v22  ;;  %734 = vmatpush.bf16.msrb.mxu1 %v725_v39 }
  0xa5   : > { %v587_v9 = vpop.f32.mrf.mxu0 }
  0xa6   : > { %v623_v10 = vpop.f32.mrf.mxu1  ;;  %v588_v14 = vadd.f32 %v1081_v11, %v587_v9 }
  0xa7   : > { %v624_v12 = vadd.f32 %v1082_v8, %v623_v10 }
  0xa8   : > { %v663_v18 = vpack.c.bf16 %v588_v14, %v588_v14 }
  0xa9   : > { %v664_v13 = vpack.c.bf16 %v624_v12, %v624_v12 }
  0xab   : > { %v670_v15 = vsel %vm665_vm1, %v664_v13, 0 }
  0xac   : > { %679 = vmatpush.bf16.xpose.msra.mxu3 %v670_v15 }
  0xad   : > { %v589_v16 = vpop.f32.mrf.mxu0  ;;  %v659_v28 = vpop.f32.mrf.mxu2 }
  0xae   : > { %v625_v17 = vpop.f32.mrf.mxu1  ;;  %v660_v29 = vadd.f32 %v1083_v27, %v659_v28 }
  0xb0   : > { %v698_v31 = vpack.c.bf16 %v660_v29, %v660_v29 }
  0xb2   : > { %v704_v33 = vsel %vm702_vm2, %v698_v31, 0 }
  0xb3   : > { %991 = vmatmul.msk.bf16.vlgmr.msra.gmra.mxu3 %vm665_vm1, %v663_v18  ;;  %713 = vmatpush.bf16.msrb.mxu0 %v704_v33 }
  0xb5   : > { %v661_v35 = vpop.f32.mrf.mxu2 }
 0x136   : > { %v681_v23 = vpop.f32.mrf.mxu3 }
 0x137   : > { %v685_v24 = vmul.f32 0.35355338, %v681_v23 }
 0x139   : > { %v686_v25 = vsel %vm665_vm1, %v685_v24, -inf }
 0x13a   : > { %687 = vmax.xlane.f32.xlu0 %v686_v25 }
 0x13e   : > { %v683_v26 = vpop.f32.mrf.mxu3 }
 0x1ad   : > { %v688_v30 = vpop.xlane.xlu0 %687 }
 0x1ae   : > { %v689_v32 = vsub.f32 %v685_v24, %v688_v30 }
 0x1b0   : > { %v690_v34 = vmul.f32 1.442695, %v689_v32 }
 0x1b2   : > { %1084 = vpow2.f32 %v690_v34 }
 0x1b8   : > { %v1085_v36 = vpop.eup %1084 }
 0x1b9   : > { %v692_v37 = vsel %vm665_vm1, %v1085_v36, 0.0 }
 0x1ba   : > { %693 = vadd.xlane.f32.xlu0 %v692_v37 }
 0x22d   : > { %v694_v40 = vpop.xlane.xlu0 %693 }
 0x22e   : > { %1086 = vrcp.f32 %v694_v40 }
 0x234   : > { %v1087_v41 = vpop.eup %1086 }
 0x235   : > { %v696_v42 = vmul.f32 %v1087_v41, %v1085_v36 }
 0x237   : > { %v697_v43 = vpack.c.bf16 %v696_v42, %v696_v42 }
 0x239   : > { %992 = vmatmul.msk.bf16.vlgmr.msrb.gmra.mxu0 %vm665_vm1, %v697_v43 }
 0x2b6   : > { %v715_v44 = vpop.f32.mrf.mxu0 }
 0x2b7   : > { %v719_v45 = vpack.c.bf16 %v715_v44, %v715_v44 }
 0x2b9   : > { %993 = vmatmul.msk.bf16.vlgmr.msrb.gmra.mxu1 %vm665_vm1, %v719_v45 }
 0x2be   : > { %v717_v46 = vpop.f32.mrf.mxu0 }
 0x336   : > { %v736_v47 = vpop.f32.mrf.mxu1 }
 0x33a   : > { %743 = sbr.rel (%p994_p0) target bundleno = 835 (0x343), region = 68 }
 0x33e   : > { %v738_v48 = vpop.f32.mrf.mxu1 }
 0x33f   : > { %v1088_v49 = vld [vmem:[%s1443_s10] ss:$0 sm:$0xff] }
 0x340   : > { %v748_v50 = vadd.f32 %v1088_v49, %v736_v47 }
 0x342   : > { %749 = vst.msk [vmem:[#allocation2] sm:$0xff] %vm574_vm0, %v748_v50 }
 0x343 PF: > { %p995_p1 = scmp.le.s32.totalorder %s1167_s20, 0 }
 0x345   : > { %753 = sbr.rel (%p995_p1) target bundleno = 846 (0x34e), region = 72 }
 0x34a   : > { %v754_v51 = vld [vmem:[#allocation2] sm:$0xff] }
 0x34b   : > { %v755_v52 = vadd.f32 %v754_v51, %v736_v47 }
 0x34d   : > { %756 = vst.msk [vmem:[#allocation2] sm:$0xff] %vm574_vm0, %v755_v52 }
 0x34e PF: > { %p996_p2 = scmp.ne.s32.totalorder %s1167_s20, 3 }
 0x350   : > { %760 = sbr.rel (%p996_p2) target bundleno = 855 (0x357), region = 76 }
 0x355   : > { %v761_v53 = vld [vmem:[#allocation2] sm:$0xff] }
 0x356   : > { %762 = vst.msk [vmem:[%s506_s25] sm:$0xff] %vm574_vm0, %v761_v53 }
 0x357 PF: > { %s998_s16 = sshll.u32 %s1171_s21, 3  ;;  %s1469_s24 = sld [smem:[#allocation16_spill]] }
 0x358   : > { %s776_s27 = sshll.u32 %s506_s25, 4  ;;  %s1471_s28 = sand.u32 1, %s1159_s18   ;;  %s777_s27 = int_to_ptr.vmem [resolvable:$true] %s776_s27 }
 0x359   : > { %s764_s12 = scalar_lea.sflag [#allocation4], %s1471_s28 }
 0x35d   : > { %s1470_s30 = smov %s1469_s24  ;;  %s774_s15 = scalar_lea.hbm %s1469_s24, %s998_s16 }
 0x35e   : > { %s778_s26 = sshll.u32 %s774_s15, 4  ;;  %s1109_s21 = scalar_lea.hbm %s1470_s30, 16  ;;  %s779_s26 = int_to_ptr.hbm [resolvable:$true] %s778_s26 }
 0x35f   : > { %s1103_s20 = sshra.s32 %s779_s26, 4  ;;  %s1104_s20 = int_to_ptr.hbm [resolvable:$true] %s1103_s20 }
 0x360   : > { %s1105_s17 = scalar_lea.hbm %s1104_s20, 8  ;;  %p1110_p7 = scmp.lt.s32.totalorder %s1104_s20, %s1470_s30 }
 0x361   : > { %p1106_p4 = scmp.ne.s32.totalorder %s1104_s20, %s1105_s17  ;;  %p1111_p8 = scmp.lt.s32.totalorder %s1109_s21, %s1105_s17 }
 0x363   : > { %p1107_p5 = pnand %p1106_p4, %p1294_p3  ;;  %p1112_p10 = por %p1111_p8, %p1110_p7 }
 0x365   : > { %p1108_p6 = pneg %p1107_p5 }
 0x367   : > { %p1113_p11 = pnand %p1112_p10, %p1108_p6 }
 0x369   : > { %1116 = shalt.err (!%p1113_p11)
}
 0x36a   : > { %1010 = dma.vmem_to_hbm [thread:$0]  (%p1294_p3), %s777_s27, 128, %s779_s26, %s764_s12  }
 0x36b PF: > { %s1472_s25 = sld [smem:[#allocation10_spill]] }
 0x36c   : > { %s1473_s14 = sld [smem:[#allocation6_spill]] }
 0x371   : > { %p1016_p12 = scmp.ge.s32.totalorder %s1472_s25, 2 }
 0x372   : > { %s790_s7 = sand.u32 1, %s1473_s14  }
 0x373   : > { %p1013_p13 = pnand %p1016_p12, %p1304_p9  ;;  %s791_s11 = scalar_lea.sflag [#allocation4], %s790_s7 }
 0x375   : > { %p1014_p0 = pneg %p1013_p13 }
 0x377   : > { %1150 = dma.done.wait (%p1014_p0), %s791_s11, 128  }
 0x378   : > { %1152 = vsyncadd (%p1014_p0), %s791_s11, 4294967168  ;;  %s24_s24 = sadd.s32 1, %s1472_s25   ;;  %s1475_s15 = sld [smem:[#allocation7_spill]] }
 0x379   : > { %p21_p1 = scmp.ge.s32.totalorder %s24_s24, 10   ;;  %s1476_s19 = sld [smem:[#allocation14_spill]] }
 0x37a   : > { %s1477_s20 = sld [smem:[#allocation8_spill]]  ;;  %s1481_s17 = smov %s1159_s18 }
 0x37b   : > { %s1478_s21 = sld [smem:[#allocation9_spill]]  ;;  %23 = sbr.rel (!%p21_p1) target bundleno = 8 (0x8), region = 138 }
 0x37c   : > { %s1479_s22 = sld [smem:[#allocation11_spill]] }
 0x37d   : > { %s1480_s23 = sld [smem:[#allocation12_spill]] }
 0x37e   : > { %s1482_s18 = smov %s1475_s15 }
 0x380   :  { %797 = vsyncpa [#allocation4], 1 }
 0x381   :  { %799 = vsyncpa [#allocation4 + $0x1], 1 }

</bundles_post_ra>
